<compile_context>
chip_gen: v7x
topology: tpu7x:2x2x1
jax: 0.10.0
libtpu: 0.0.40
codegen_flags: <defaults>
</compile_context>

<pallas_src>
import jax
import jax.numpy as jnp
from jax.experimental import pallas as pl
from jax.experimental.pallas import tpu as pltpu


_LANE = 128


def _round_up(a, b):
    return (a + b - 1) // b * b


# ------------------------------ fused kernel --------------------------------
def _fused_convt_bn_kernel(x_ref, w_ref, b_ref, o_ref):
    """o = W_eff @ x + b_eff  (ConvTranspose taps + BatchNorm already folded).

    x_ref: (Cin, thw)   activation tile, spatial (H*W) on lanes  (lane-dense)
    w_ref: (C4, Cin)    resident folded weights, C4 = 4*Cout taps (co, di, dj)
    b_ref: (C4, 1)      resident folded bias
    o_ref: (C4, thw)    output tile, spatial on lanes
    """
    cin = x_ref.shape[0]
    if cin <= 16:
        # Tiny contraction: the MXU would pad K to 128/256 and run ~empty systolic
        # passes.  Do an unrolled VPU broadcast-FMA over Cin instead (static loop).
        acc = w_ref[:, 0:1] * x_ref[0:1, :] + b_ref[...]
        for c in range(1, cin):
            acc = acc + w_ref[:, c:c + 1] * x_ref[c:c + 1, :]
        o_ref[...] = acc
    else:
        o_ref[...] = (jnp.dot(w_ref[...], x_ref[...],
                              preferred_element_type=jnp.float32) + b_ref[...])


# ------------------------------ forward pass --------------------------------
def upsampling_layer_forward(x, w_t, b_t, gamma, beta, eps=1e-5):
    """ConvTranspose2d(k=2, s=2, p=0) + BatchNorm2d (training-mode batch stats).

    x:     (N, Cin, H, W) float32 (NCHW, PyTorch convention)
    w_t:   (Cin, Cout, 2, 2)   ConvTranspose2d weight
    b_t:   (Cout,)             ConvTranspose2d bias
    gamma: (Cout,)  beta: (Cout,)   BatchNorm affine params
    returns (N, Cout, 2H, 2W) float32
    """
    N, Cin, H, W = x.shape
    Cout = w_t.shape[1]
    C4 = 4 * Cout
    HW = H * W

    # ---- BatchNorm batch statistics, analytically from the input (cheap XLA) ----
    # conv-transpose is linear => per-channel output mean/var follow from the input
    # channel means and the centered (Cin, Cin) Gram matrix (stable, no cancellation).
    x3 = x.reshape(N, Cin, HW)                             # bitcast, no copy
    cnt = jnp.float32(N * HW)                              # elems per tap per channel
    xbar = jnp.sum(x3, axis=(0, 2)) / cnt                  # (Cin,)
    xc = x3 - xbar[None, :, None]
    gram = jnp.einsum('ncs,nds->cd', xc, xc)               # (Cin, Cin)

    w4 = jnp.transpose(w_t, (2, 3, 1, 0)).reshape(4, Cout, Cin)      # [tap, co, cin]
    mu_col = w4 @ xbar + b_t[None, :]                                # (4, Cout)
    var_col = jnp.einsum('toc,cd,tod->to', w4, gram, w4) / cnt       # (4, Cout)
    mu = jnp.mean(mu_col, axis=0)                                    # (Cout,)
    var = jnp.mean(var_col + (mu_col - mu[None, :]) ** 2, axis=0)    # biased (PyTorch BN)
    scale = gamma * jax.lax.rsqrt(var + eps)
    shift = beta - mu * scale

    # ---- fold conv bias + BN affine into the weights -------------------------
    # folded row order: c4 = co*4 + di*2 + dj
    w_eff = jnp.transpose(w_t * scale[None, :, None, None], (1, 2, 3, 0))
    w_eff = w_eff.reshape(C4, Cin).astype(jnp.float32)
    b_eff = (b_t * scale + shift).astype(jnp.float32)
    b_eff = jnp.repeat(b_eff, 4).reshape(C4, 1)

    # ---- tiling: spatial (H*W) on lanes, sized against a VMEM budget ---------
    budget = 8 * 1024 * 1024            # streaming bytes/step; safe on v7x (64 MiB VMEM)
    per_lane = 4 * 2 * (Cin + C4)       # f32, double-buffered x tile + y tile
    thw_cap = max(_LANE, (budget // per_lane) // _LANE * _LANE)
    thw = min(_round_up(HW, _LANE), thw_cap)
    HWp = _round_up(HW, thw)
    if HWp != HW:
        x3 = jnp.pad(x3, ((0, 0), (0, 0), (0, HWp - HW)))   # tail handled by padding

    grid = (N, HWp // thw)
    y = pl.pallas_call(
        _fused_convt_bn_kernel,
        out_shape=jax.ShapeDtypeStruct((N, C4, HWp), jnp.float32),
        grid=grid,
        in_specs=[
            pl.BlockSpec((None, Cin, thw), lambda n, t: (n, 0, t)),   # activations
            pl.BlockSpec((C4, Cin), lambda n, t: (0, 0)),             # resident weights
            pl.BlockSpec((C4, 1), lambda n, t: (0, 0)),               # resident bias
        ],
        out_specs=pl.BlockSpec((None, C4, thw), lambda n, t: (n, 0, t)),
        compiler_params=pltpu.CompilerParams(
            dimension_semantics=("parallel", "parallel")),            # megacore-friendly
    )(x3, w_eff, b_eff)

    # ---- reassemble NCHW: (co, di, dj, i, j) -> (co, 2i+di, 2j+dj) ------------
    # TODO(synk): fold this stride-2 pixel interleave into the kernel (strided
    # sublane/lane stores into an (N, Cout, 2H, 2W) out_spec) to drop this one
    # remaining output-sized XLA transpose copy.
    y = y[:, :, :HW].reshape(N, Cout, 2, 2, H, W)
    out = jnp.transpose(y, (0, 1, 4, 2, 5, 3)).reshape(N, Cout, 2 * H, 2 * W)
    return out


# ------------------------------ reference -----------------------------------
def reference_forward(x, w_t, b_t, gamma, beta, eps=1e-5):
    N, Cin, H, W = x.shape
    Cout = w_t.shape[1]
    # conv-transpose k=2, s=2, p=0 (non-overlapping taps)
    y = jnp.einsum('ncij,cokl->nijklo', x, w_t) + b_t
    y = jnp.transpose(y, (0, 5, 1, 3, 2, 4)).reshape(N, Cout, 2 * H, 2 * W)
    mean = jnp.mean(y, axis=(0, 2, 3), keepdims=True)
    var = jnp.mean((y - mean) ** 2, axis=(0, 2, 3), keepdims=True)
    yn = (y - mean) * jax.lax.rsqrt(var + eps)
    return yn * gamma.reshape(1, -1, 1, 1) + beta.reshape(1, -1, 1, 1)


if __name__ == "__main__":
    key = jax.random.PRNGKey(0)
    k1, k2, k3 = jax.random.split(key, 3)

    N, Cin, Cout, H, W = 2, 4, 8, 16, 16
    x = jax.random.normal(k1, (N, Cin, H, W), dtype=jnp.float32)
    # ConvTranspose2d weight shape: (in_channel, out_channel, 2, 2)
    w_t = 0.1 * jax.random.normal(k2, (Cin, Cout, 2, 2), dtype=jnp.float32)
    b_t = 0.1 * jax.random.normal(k3, (Cout,), dtype=jnp.float32)
    gamma = jnp.ones((Cout,), dtype=jnp.float32)   # BatchNorm2d default init
    beta = jnp.zeros((Cout,), dtype=jnp.float32)

    fwd = jax.jit(upsampling_layer_forward)
    out = jax.block_until_ready(fwd(x, w_t, b_t, gamma, beta))

    ref = reference_forward(x, w_t, b_t, gamma, beta)
    assert out.shape == (N, Cout, 2 * H, 2 * W)
    max_err = float(jnp.max(jnp.abs(out - ref)))
    assert jnp.allclose(out, ref, atol=1e-4, rtol=1e-4), max_err

    print("KERNEL_OK")
</pallas_src>

<mosaic_0001>
module attributes {stable_mosaic.version = 11 : i64} {
  func.func @_fused_convt_bn_kernel(%arg0: i32, %arg1: i32, %arg2: memref<1x4x256xf32, #tpu.memory_space<vmem>>, %arg3: memref<32x4xf32, #tpu.memory_space<vmem>>, %arg4: memref<32x1xf32, #tpu.memory_space<vmem>>, %arg5: memref<1x32x256xf32, #tpu.memory_space<vmem>>) attributes {dimension_semantics = [#tpu.dimension_semantics<parallel>, #tpu.dimension_semantics<parallel>], iteration_bounds = array<i64: 2, 1>, scalar_prefetch = 0 : i64, scratch_operands = 0 : i64, tpu.core_type = #tpu.core_type<tc>, window_params = [{transform_indices = @transform_0, window_bounds = array<i64: 1, 4, 256>}, {pipeline_mode = #tpu.pipeline_mode<synchronous>, transform_indices = @transform_1, window_bounds = array<i64: 32, 4>}, {pipeline_mode = #tpu.pipeline_mode<synchronous>, transform_indices = @transform_2, window_bounds = array<i64: 32, 1>}, {transform_indices = @transform_3, window_bounds = array<i64: 1, 32, 256>}]} {
    %c0 = arith.constant 0 : index
    %c0_0 = arith.constant 0 : index
    %0 = vector.load %arg3[%c0, %c0_0] : memref<32x4xf32, #tpu.memory_space<vmem>>, vector<32x1xf32>
    %c0_1 = arith.constant 0 : index
    %c0_2 = arith.constant 0 : index
    %c0_3 = arith.constant 0 : index
    %1 = vector.load %arg2[%c0_1, %c0_2, %c0_3] : memref<1x4x256xf32, #tpu.memory_space<vmem>>, vector<1x1x256xf32>
    %2 = vector.shape_cast %1 : vector<1x1x256xf32> to vector<1x256xf32>
    %3 = vector.broadcast %0 : vector<32x1xf32> to vector<32x256xf32>
    %4 = vector.broadcast %2 : vector<1x256xf32> to vector<32x256xf32>
    %5 = arith.mulf %3, %4 : vector<32x256xf32>
    %c0_4 = arith.constant 0 : index
    %c0_5 = arith.constant 0 : index
    %6 = vector.load %arg4[%c0_4, %c0_5] : memref<32x1xf32, #tpu.memory_space<vmem>>, vector<32x1xf32>
    %7 = vector.broadcast %6 : vector<32x1xf32> to vector<32x256xf32>
    %8 = arith.addf %5, %7 : vector<32x256xf32>
    %c0_6 = arith.constant 0 : index
    %c1 = arith.constant 1 : index
    %9 = vector.load %arg3[%c0_6, %c1] : memref<32x4xf32, #tpu.memory_space<vmem>>, vector<32x1xf32>
    %c0_7 = arith.constant 0 : index
    %c1_8 = arith.constant 1 : index
    %c0_9 = arith.constant 0 : index
    %10 = vector.load %arg2[%c0_7, %c1_8, %c0_9] : memref<1x4x256xf32, #tpu.memory_space<vmem>>, vector<1x1x256xf32>
    %11 = vector.shape_cast %10 : vector<1x1x256xf32> to vector<1x256xf32>
    %12 = vector.broadcast %9 : vector<32x1xf32> to vector<32x256xf32>
    %13 = vector.broadcast %11 : vector<1x256xf32> to vector<32x256xf32>
    %14 = arith.mulf %12, %13 : vector<32x256xf32>
    %15 = arith.addf %8, %14 : vector<32x256xf32>
    %c0_10 = arith.constant 0 : index
    %c2 = arith.constant 2 : index
    %16 = vector.load %arg3[%c0_10, %c2] : memref<32x4xf32, #tpu.memory_space<vmem>>, vector<32x1xf32>
    %c0_11 = arith.constant 0 : index
    %c2_12 = arith.constant 2 : index
    %c0_13 = arith.constant 0 : index
    %17 = vector.load %arg2[%c0_11, %c2_12, %c0_13] : memref<1x4x256xf32, #tpu.memory_space<vmem>>, vector<1x1x256xf32>
    %18 = vector.shape_cast %17 : vector<1x1x256xf32> to vector<1x256xf32>
    %19 = vector.broadcast %16 : vector<32x1xf32> to vector<32x256xf32>
    %20 = vector.broadcast %18 : vector<1x256xf32> to vector<32x256xf32>
    %21 = arith.mulf %19, %20 : vector<32x256xf32>
    %22 = arith.addf %15, %21 : vector<32x256xf32>
    %c0_14 = arith.constant 0 : index
    %c3 = arith.constant 3 : index
    %23 = vector.load %arg3[%c0_14, %c3] : memref<32x4xf32, #tpu.memory_space<vmem>>, vector<32x1xf32>
    %c0_15 = arith.constant 0 : index
    %c3_16 = arith.constant 3 : index
    %c0_17 = arith.constant 0 : index
    %24 = vector.load %arg2[%c0_15, %c3_16, %c0_17] : memref<1x4x256xf32, #tpu.memory_space<vmem>>, vector<1x1x256xf32>
    %25 = vector.shape_cast %24 : vector<1x1x256xf32> to vector<1x256xf32>
    %26 = vector.broadcast %23 : vector<32x1xf32> to vector<32x256xf32>
    %27 = vector.broadcast %25 : vector<1x256xf32> to vector<32x256xf32>
    %28 = arith.mulf %26, %27 : vector<32x256xf32>
    %29 = arith.addf %22, %28 : vector<32x256xf32>
    %c0_18 = arith.constant 0 : index
    %c0_19 = arith.constant 0 : index
    %c0_20 = arith.constant 0 : index
    %30 = vector.load %arg5[%c0_18, %c0_19, %c0_20] : memref<1x32x256xf32, #tpu.memory_space<vmem>>, vector<1x32x256xf32>
    %31 = vector.shape_cast %30 : vector<1x32x256xf32> to vector<32x256xf32>
    %32 = vector.shape_cast %29 : vector<32x256xf32> to vector<1x32x256xf32>
    tpu.vector_store %arg5[%c0_18, %c0_19, %c0_20], %32 {strides = array<i32>} : memref<1x32x256xf32, #tpu.memory_space<vmem>>, vector<1x32x256xf32>,
    return
  }
  func.func @transform_0(%arg0: i32, %arg1: i32) -> (i32, i32, i32) {
    %c0_i32 = arith.constant 0 : i32
    %c0_i32_0 = arith.constant 0 : i32
    return %arg0, %c0_i32, %arg1 : i32, i32, i32
  }
  func.func @transform_1(%arg0: i32, %arg1: i32) -> (i32, i32) {
    %c0_i32 = arith.constant 0 : i32
    %c0_i32_0 = arith.constant 0 : i32
    %c0_i32_1 = arith.constant 0 : i32
    return %c0_i32, %c0_i32_0 : i32, i32
  }
  func.func @transform_2(%arg0: i32, %arg1: i32) -> (i32, i32) {
    %c0_i32 = arith.constant 0 : i32
    %c0_i32_0 = arith.constant 0 : i32
    %c0_i32_1 = arith.constant 0 : i32
    return %c0_i32, %c0_i32_0 : i32, i32
  }
  func.func @transform_3(%arg0: i32, %arg1: i32) -> (i32, i32, i32) {
    %c0_i32 = arith.constant 0 : i32
    %c0_i32_0 = arith.constant 0 : i32
    return %arg0, %c0_i32, %arg1 : i32, i32, i32
  }
}

</mosaic_0001>

<bundles_post_ra>
// kernel: upsampling_layer_forward.1
= control target key start
LH: loop header
LB: loop body
LE: loop exit
PB: predicated region body
PF: predicated region fallthrough
CT: control target
= control target key end

     0   :  { %s616_s12 = smov 0   ;;  %s618_s13 = smov 0   ;;  %s727_s0 = inlined_call_operand.vmem [shape: f32[2,4,256], index: 0, kind: input, shape index: {}]   ;;  %s728_s1 = inlined_call_operand.vmem [shape: f32[32,4], index: 1, kind: input, shape index: {}]   ;;  %s729_s2 = inlined_call_operand.vmem [shape: f32[32,1], index: 2, kind: input, shape index: {}]   ;;  %s730_s3 = inlined_call_operand.vmem [shape: f32[2,32,256], index: 3, kind: output, shape index: {}]  }
   0x1   :  { %s620_s14 = smov 0  }
   0x2 LB: > { %s25_s15 = sadd.s32 1, %s586_s13  ;;  %p520_p0 = scmp.ge.s32.totalorder %s590_s14, 1  ;;  %s590_s14 = sphi %s620_s14, %s13_s14   ;;  %s586_s13 = sphi %s618_s13, %s732_s13   ;;  %s582_s12 = sphi %s616_s12, %s731_s12  }
   0x3   : > { %p27_p1 = scmp.ge.s32.totalorder %s25_s15, 2  ;;  %p158_p2 = scmp.lt.s32.totalorder %s590_s14, 3 }
   0x5   : > { %s734_s15 = smov (%p27_p1, %s25_s15), 0  ;;  %p159_p3 = pnand %p520_p0, %p158_p2 }
   0x6   : > { %v212_v0 = vld [vmem:[%s728_s1 + $0x10] sm:$0xff] (!%p159_p3)  ;;  %v210_v1 = vld [vmem:[%s728_s1] sm:$0xff] (!%p159_p3)  ;;  %v592_v2 = vmov (!%p159_p3), 0   ;;  %v213_v3 = vld [vmem:[%s728_s1 + $0x18] sm:$0xff] (!%p159_p3)  ;;  %v593_v9 = vmov (!%p159_p3), 1   ;;  %v594_v10 = vmov (!%p159_p3), 2   ;;  %v236_v18 = vlaneseq (!%p159_p3) }
   0x7   : > { %162 = sbr.rel (%p159_p3) target bundleno = 184 (0xb8), region = 32  ;;  %561 = vset.pattern.permute.xlu1 (!%p159_p3), %v592_v2  ;;  %560 = vset.pattern.permute.xlu0 (!%p159_p3), %v592_v2  ;;  %v211_v4 = vld [vmem:[%s728_s1 + $0x8] sm:$0xff] (!%p159_p3)  ;;  %v254_v6 = vld [vmem:[%s729_s2] sm:$0xff] (!%p159_p3)  ;;  %v257_v7 = vld [vmem:[%s729_s2 + $0x18] sm:$0xff] (!%p159_p3)  ;;  %v595_v11 = vmov (!%p159_p3), 3   ;;  %p191_p4 = scmp.lt.s32.totalorder (!%p159_p3), %s582_s12, 1 }
   0x8   : > { %227 = vperm.xlu1 (!%p159_p3), %561, %v212_v0   ;;  %217 = vperm.xlu0 (!%p159_p3), %560, %v210_v1   ;;  %v255_v5 = vld [vmem:[%s729_s2 + $0x8] sm:$0xff] (!%p159_p3)  ;;  %v256_v8 = vld [vmem:[%s729_s2 + $0x10] sm:$0xff] (!%p159_p3)  ;;  %v237_v21 = vshrl.u32 (!%p159_p3), %v236_v18, 7 }
   0xa   : > { %v238_v24 = vsub.s32 (!%p159_p3), 0, %v237_v21  ;;  %v242_v25 = vsub.s32 (!%p159_p3), 1, %v237_v21 }
   0xc   : > { %232 = vperm.xlu1 (!%p159_p3), %561, %v213_v3   ;;  %222 = vperm.xlu0 (!%p159_p3), %560, %v211_v4  }
   0xe   : > { %s736_s12 = smov (!%p191_p4, %s582_s12), 1 }
   0xf   : > { %s530_s5 = sshll.u32 %s736_s12, 3  ;;  %s531_s9 = sshll.u32 %s736_s12, 6 }
  0x10   : > { %265 = vperm.xlu1 %561, %v255_v5   ;;  %260 = vperm.xlu0 %560, %v254_v6   ;;  %s198_s8 = scalar_lea.vmem %s727_s0, %s530_s5  ;;  %s690_s16 = scalar_lea.vmem %s730_s3, %s531_s9 }
  0x11   : > { %v214_v26 = vld [vmem:[%s198_s8] ss:$4 sm:$0x3]  ;;  %v525_v27 = vld [vmem:[%s198_s8 + $0x1] ss:$4 sm:$0x3] }
  0x12   : > { %v526_v30 = vld [vmem:[%s198_s8 + $0x2] ss:$4 sm:$0x3]  ;;  %v239_v31 = vrot.slane %v214_v26, %v238_v24  ;;  %v243_v32 = vrot.slane %v214_v26, %v242_v25  ;;  %v308_v33 = vrot.slane %v525_v27, %v238_v24  ;;  %v312_v34 = vrot.slane %v525_v27, %v242_v25  ;;  %v527_v39 = vld [vmem:[%s198_s8 + $0x3] ss:$4 sm:$0x3] }
  0x13   : > { %v674_v37 = vrot.slane %v526_v30, %v238_v24  ;;  %v676_v38 = vrot.slane %v526_v30, %v242_v25  ;;  %v678_v44 = vrot.slane %v527_v39, %v238_v24  ;;  %v680_v45 = vrot.slane %v527_v39, %v242_v25 }
  0x14   : > { %275 = vperm.xlu1 %561, %v257_v7   ;;  %270 = vperm.xlu0 %560, %v256_v8  }
  0x18   : > { %563 = vset.pattern.permute.xlu1 %v593_v9  ;;  %562 = vset.pattern.permute.xlu0 %v593_v9 }
  0x19   : > { %293 = vperm.xlu1 %563, %v211_v4   ;;  %289 = vperm.xlu0 %562, %v210_v1  }
  0x1d   : > { %297 = vperm.xlu1 %563, %v212_v0   ;;  %301 = vperm.xlu0 %562, %v213_v3  }
  0x21   : > { %564 = vset.pattern.permute.xlu1 %v594_v10  ;;  %565 = vset.pattern.permute.xlu0 %v594_v10 }
  0x22   : > { %334 = vperm.xlu1 %564, %v210_v1   ;;  %338 = vperm.xlu0 %565, %v211_v4  }
  0x26   : > { %342 = vperm.xlu1 %564, %v212_v0   ;;  %566 = vset.pattern.permute.xlu0 %v595_v11 }
  0x27   : > { %379 = vperm.xlu0 %566, %v210_v1  }
  0x2a   : > { %346 = vperm.xlu1 %564, %v213_v3  }
  0x2b   : > { %391 = vperm.xlu0 %566, %v213_v3  }
  0x2e   : > { %567 = vset.pattern.permute.xlu1 %v595_v11 }
  0x2f   : > { %383 = vperm.xlu1 %567, %v211_v4  }
  0x33   : > { %387 = vperm.xlu1 %567, %v212_v0  }
  0x87   : > { %v660_v12 = vpop.permute.xlu1 %227  ;;  %v218_v13 = vpop.permute.xlu0 %217 }
  0x88   : > { %v246_v35 = vmul.f32 %v239_v31, %v218_v13  ;;  %v247_v36 = vmul.f32 %v243_v32, %v218_v13  ;;  %v250_v18 = vmul.f32 %v239_v31, %v660_v12 }
  0x8b   : > { %v233_v14 = vpop.permute.xlu1 %232  ;;  %v223_v15 = vpop.permute.xlu0 %222 }
  0x8c   : > { %v252_v50 = vmul.f32 %v239_v31, %v233_v14  ;;  %v253_v51 = vmul.f32 %v243_v32, %v233_v14  ;;  %v248_v52 = vmul.f32 %v239_v31, %v223_v15  ;;  %v249_v53 = vmul.f32 %v243_v32, %v223_v15 }
  0x8f   : > { %v266_v16 = vpop.permute.xlu1 %265  ;;  %v261_v17 = vpop.permute.xlu0 %260 }
  0x90   : > { %v278_v46 = vadd.f32 %v261_v17, %v246_v35  ;;  %v279_v47 = vadd.f32 %v261_v17, %v247_v36  ;;  %v280_v2 = vadd.f32 %v266_v16, %v248_v52  ;;  %v281_v3 = vadd.f32 %v266_v16, %v249_v53 }
  0x91   : > { %v251_v16 = vmul.f32 %v243_v32, %v660_v12 }
  0x93   : > { %v276_v19 = vpop.permute.xlu1 %275  ;;  %v666_v20 = vpop.permute.xlu0 %270 }
  0x94   : > { %v284_v59 = vadd.f32 %v276_v19, %v252_v50  ;;  %v285_v60 = vadd.f32 %v276_v19, %v253_v51  ;;  %v282_v26 = vadd.f32 %v666_v20, %v250_v18  ;;  %v283_v27 = vadd.f32 %v666_v20, %v251_v16 }
  0x98   : > { %v294_v22 = vpop.permute.xlu1 %293  ;;  %v290_v23 = vpop.permute.xlu0 %289 }
  0x99   : > { %v315_v40 = vmul.f32 %v308_v33, %v290_v23  ;;  %v316_v41 = vmul.f32 %v312_v34, %v290_v23  ;;  %v317_v4 = vmul.f32 %v308_v33, %v294_v22  ;;  %v318_v5 = vmul.f32 %v312_v34, %v294_v22 }
  0x9b   : > { %v323_v54 = vadd.f32 %v315_v40, %v278_v46  ;;  %v324_v55 = vadd.f32 %v316_v41, %v279_v47  ;;  %v325_v22 = vadd.f32 %v317_v4, %v280_v2  ;;  %v326_v23 = vadd.f32 %v318_v5, %v281_v3 }
  0x9c   : > { %v672_v28 = vpop.permute.xlu1 %297  ;;  %v302_v29 = vpop.permute.xlu0 %301 }
  0x9d   : > { %v321_v56 = vmul.f32 %v308_v33, %v302_v29  ;;  %v322_v57 = vmul.f32 %v312_v34, %v302_v29  ;;  %v319_v29 = vmul.f32 %v308_v33, %v672_v28  ;;  %v320_v12 = vmul.f32 %v312_v34, %v672_v28 }
  0x9f   : > { %v329_v6 = vadd.f32 %v321_v56, %v284_v59  ;;  %v330_v7 = vadd.f32 %v322_v57, %v285_v60  ;;  %v327_v20 = vadd.f32 %v319_v29, %v282_v26  ;;  %v328_v28 = vadd.f32 %v320_v12, %v283_v27 }
  0xa1   : > { %v335_v42 = vpop.permute.xlu1 %334  ;;  %v339_v43 = vpop.permute.xlu0 %338 }
  0xa2   : > { %v360_v48 = vmul.f32 %v674_v37, %v335_v42  ;;  %v361_v49 = vmul.f32 %v676_v38, %v335_v42  ;;  %v362_v11 = vmul.f32 %v674_v37, %v339_v43  ;;  %v363_v13 = vmul.f32 %v676_v38, %v339_v43 }
  0xa4   : > { %v368_v62 = vadd.f32 %v360_v48, %v323_v54  ;;  %v369_v63 = vadd.f32 %v361_v49, %v324_v55  ;;  %v370_v30 = vadd.f32 %v362_v11, %v325_v22  ;;  %v371_v31 = vadd.f32 %v363_v13, %v326_v23 }
  0xa5   : > { %v343_v58 = vpop.permute.xlu1 %342 }
  0xa6   : > { %v380_v61 = vpop.permute.xlu0 %379  ;;  %v364_v39 = vmul.f32 %v674_v37, %v343_v58  ;;  %v365_v40 = vmul.f32 %v676_v38, %v343_v58 }
  0xa7   : > { %v405_v0 = vmul.f32 %v678_v44, %v380_v61  ;;  %v406_v1 = vmul.f32 %v680_v45, %v380_v61 }
  0xa8   : > { %v372_v46 = vadd.f32 %v364_v39, %v327_v20  ;;  %v373_v47 = vadd.f32 %v365_v40, %v328_v28 }
  0xa9   : > { %v413_v8 = vadd.f32 %v405_v0, %v368_v62  ;;  %v414_v9 = vadd.f32 %v406_v1, %v369_v63  ;;  %v347_v10 = vpop.permute.xlu1 %346 }
  0xaa   : > { %v366_v14 = vmul.f32 %v674_v37, %v347_v10  ;;  %v367_v15 = vmul.f32 %v676_v38, %v347_v10  ;;  %v392_v17 = vpop.permute.xlu0 %391 }
  0xab   : > { %421 = vst [vmem:[%s690_s16] sm:$0xff] %v413_v8  ;;  %422 = vst [vmem:[%s690_s16 + $0x8] sm:$0xff] %v414_v9  ;;  %v411_v19 = vmul.f32 %v678_v44, %v392_v17  ;;  %v412_v21 = vmul.f32 %v680_v45, %v392_v17 }
  0xac   : > { %v374_v24 = vadd.f32 %v366_v14, %v329_v6  ;;  %v375_v25 = vadd.f32 %v367_v15, %v330_v7 }
  0xae   : > { %v419_v32 = vadd.f32 %v411_v19, %v374_v24  ;;  %v420_v35 = vadd.f32 %v412_v21, %v375_v25  ;;  %v384_v36 = vpop.permute.xlu1 %383 }
  0xaf   : > { %v407_v41 = vmul.f32 %v678_v44, %v384_v36  ;;  %v408_v42 = vmul.f32 %v680_v45, %v384_v36 }
  0xb0   : > { %427 = vst [vmem:[%s690_s16 + $0x30] sm:$0xff] %v419_v32  ;;  %428 = vst [vmem:[%s690_s16 + $0x38] sm:$0xff] %v420_v35 }
  0xb1   : > { %v415_v33 = vadd.f32 %v407_v41, %v370_v30  ;;  %v416_v34 = vadd.f32 %v408_v42, %v371_v31 }
  0xb2   : > { %v388_v43 = vpop.permute.xlu1 %387 }
  0xb3   : > { %423 = vst [vmem:[%s690_s16 + $0x10] sm:$0xff] %v415_v33  ;;  %424 = vst [vmem:[%s690_s16 + $0x18] sm:$0xff] %v416_v34  ;;  %v409_v37 = vmul.f32 %v678_v44, %v388_v43  ;;  %v410_v38 = vmul.f32 %v680_v45, %v388_v43 }
  0xb5   : > { %v417_v48 = vadd.f32 %v409_v37, %v372_v46  ;;  %v418_v49 = vadd.f32 %v410_v38, %v373_v47 }
  0xb7   : > { %425 = vst [vmem:[%s690_s16 + $0x20] sm:$0xff] %v417_v48  ;;  %426 = vst [vmem:[%s690_s16 + $0x28] sm:$0xff] %v418_v49 }
  0xb8 PF: > { %s13_s14 = sadd.s32 1, %s590_s14   ;;  %s731_s12 = smov %s586_s13 }
  0xb9   : > { %p10_p5 = scmp.ge.s32.totalorder %s13_s14, 4   ;;  %s732_s13 = smov %s734_s15 }
  0xbb   :  { %12 = sbr.rel (!%p10_p5) target bundleno = 2 (0x2), region = 65 }

</bundles_post_ra>
